<compile_context>
chip_gen: v7x
topology: tpu7x:2x2x1
jax: 0.10.0
libtpu: 0.0.40
codegen_flags: <defaults>
</compile_context>

<pallas_src>
import jax
import jax.numpy as jnp
from jax import lax
from jax.experimental import pallas as pl
from jax.experimental.pallas import tpu as pltpu


def _round_up(n, m):
    return ((n + m - 1) // m) * m


def numeric_ae_kernel(x_ref, w1_ref, b1_ref, w2_ref, b2_ref, o_ref):
    # x_ref: (TB, D_in)   w1_ref: (H, D_in)   b1_ref: (1, H)     [f32]
    # w2_ref: (D_lat, H)  b2_ref: (1, D_lat)  [f32]   o_ref: (TB, D_lat)
    tb, _ = x_ref.shape
    h_dim = w1_ref.shape[0]
    d_lat = w2_ref.shape[0]

    # Chunk the batch tile so the f32 hidden activation per chunk stays <= ~16 vregs.
    if tb % 256 == 0:
        chunk = 256
    elif tb % 128 == 0:
        chunk = 128
    else:
        chunk = tb
    n_chunks = tb // chunk

    w1 = w1_ref[...]
    w2 = w2_ref[...]
    # Hoist bias broadcasts out of the (unrolled) chunk loop.
    b1b = jnp.broadcast_to(b1_ref[...], (chunk, h_dim))     # f32
    b2b = jnp.broadcast_to(b2_ref[...], (chunk, d_lat))     # f32

    def body(c, carry):
        r = pl.multiple_of(c * chunk, chunk)
        x = x_ref[pl.ds(r, chunk), :]
        # h = x @ W1^T  (PyTorch (out, in) weight layout), f32 accumulate on the MXU.
        h = lax.dot_general(x, w1, (((1,), (1,)), ((), ())),
                            preferred_element_type=jnp.float32)
        h = jnp.maximum(h + b1b, 0.0)            # bias-add + ReLU in f32
        h = h.astype(w2.dtype)                   # feed the MXU at the parameter dtype
        out = lax.dot_general(h, w2, (((1,), (1,)), ((), ())),
                              preferred_element_type=jnp.float32) + b2b
        o_ref[pl.ds(r, chunk), :] = out.astype(o_ref.dtype)
        return carry

    lax.fori_loop(0, n_chunks, body, 0, unroll=True)


def _choose_tile_b(B, tile_b):
    """Batch-tile: multiple of 8 (sublane), <= tile_b, and small enough that the grid has
    >= 2 steps when the batch allows it (v7x megacore sharding of the 'parallel' axis)."""
    b_pad = _round_up(B, 8)
    tb = min(_round_up(max(tile_b, 1), 128), b_pad)
    if b_pad > 128:
        half = _round_up((b_pad + 1) // 2, 128)
        tb = min(tb, half)
    return max(tb, 8)


def numeric_ae_forward(x, w1, b1, w2, b2, *, tile_b=4096, vmem_limit_bytes=None):
    """NumericAE forward.

    x : (B, D_in)                activations (f32 or bf16; bf16 halves HBM read traffic)
    w1: (64, D_in),  b1: (64,)   first Linear (PyTorch (out, in) layout)
    w2: (D_lat, 64), b2: (D_lat,)
    returns: (B, D_lat) in x.dtype
    """
    B, D_in = x.shape
    H, d_in_w = w1.shape
    assert d_in_w == D_in
    D_lat, h_w = w2.shape
    assert h_w == H

    act_bytes = jnp.dtype(x.dtype).itemsize
    par_bytes = jnp.dtype(w1.dtype).itemsize

    tb = _choose_tile_b(B, tile_b)

    # VMEM: double-buffered x/out tiles + resident weights/biases.  Shrink the tile (do not
    # assert) to leave headroom under the smallest default scoped-VMEM budget (v5e 16 MiB;
    # v6e/v7x 32 MiB) unless the caller raised the limit explicitly.
    budget = vmem_limit_bytes if vmem_limit_bytes is not None else 12 * 1024 * 1024

    def vmem_est(t):
        return (2 * t * (D_in + D_lat) * act_bytes
                + (H * D_in + D_lat * H) * par_bytes
                + (H + D_lat) * 4)

    while tb > 128 and vmem_est(tb) > budget:
        tb = max(128, _round_up(tb // 2, 128))

    grid = (pl.cdiv(B, tb),)

    b1c = b1.reshape(1, H).astype(jnp.float32)
    b2c = b2.reshape(1, D_lat).astype(jnp.float32)

    flops = 2 * B * (D_in * H + H * D_lat)
    bytes_accessed = (B * (D_in + D_lat) * act_bytes
                      + (H * D_in + D_lat * H) * par_bytes
                      + (H + D_lat) * 4)
    cost = pl.CostEstimate(flops=flops, transcendentals=0,
                           bytes_accessed=bytes_accessed)

    return pl.pallas_call(
        numeric_ae_kernel,
        out_shape=jax.ShapeDtypeStruct((B, D_lat), x.dtype),
        grid_spec=pltpu.PrefetchScalarGridSpec(
            num_scalar_prefetch=0,
            grid=grid,
            in_specs=[
                pl.BlockSpec((tb, D_in), lambda i: (i, 0)),   # x tile (contiguous DMA, pipelined)
                pl.BlockSpec((H, D_in), lambda i: (0, 0)),    # W1 (resident)
                pl.BlockSpec((1, H), lambda i: (0, 0)),       # b1 (f32)
                pl.BlockSpec((D_lat, H), lambda i: (0, 0)),   # W2 (resident)
                pl.BlockSpec((1, D_lat), lambda i: (0, 0)),   # b2 (f32)
            ],
            out_specs=pl.BlockSpec((tb, D_lat), lambda i: (i, 0)),
        ),
        compiler_params=pltpu.CompilerParams(
            dimension_semantics=("parallel",),   # batch axis -> v7x megacore shardable
            vmem_limit_bytes=vmem_limit_bytes,
        ),
        cost_estimate=cost,
    )(x, w1, b1c, w2, b2c)


if __name__ == "__main__":
    key = jax.random.PRNGKey(0)
    k_x, k_w1, k_b1, k_w2, k_b2, k_x2 = jax.random.split(key, 6)

    # Small shapes consistent with the module: batch=8, input_dim=32, latent_dim=8.
    B, D_in, H, D_lat = 8, 32, 64, 8

    x = jax.random.normal(k_x, (B, D_in), dtype=jnp.float32)

    # Parameters in native PyTorch Linear layout: weight (out, in), bias (out,).
    lim1 = 1.0 / jnp.sqrt(jnp.float32(D_in))
    w1 = jax.random.uniform(k_w1, (H, D_in), minval=-lim1, maxval=lim1, dtype=jnp.float32)
    b1 = jax.random.uniform(k_b1, (H,), minval=-lim1, maxval=lim1, dtype=jnp.float32)
    lim2 = 1.0 / jnp.sqrt(jnp.float32(H))
    w2 = jax.random.uniform(k_w2, (D_lat, H), minval=-lim2, maxval=lim2, dtype=jnp.float32)
    b2 = jax.random.uniform(k_b2, (D_lat,), minval=-lim2, maxval=lim2, dtype=jnp.float32)

    def ref_fwd(xx):
        return jnp.maximum(xx @ w1.T + b1, 0.0) @ w2.T + b2

    # 1) f32, small batch -> single tile.
    out = jax.block_until_ready(numeric_ae_forward(x, w1, b1, w2, b2))
    ref = ref_fwd(x)
    assert out.shape == (B, D_lat)
    assert jnp.allclose(out, ref, atol=1e-4, rtol=1e-4)

    # 2) f32, ragged batch -> multi-step grid with a partial boundary block (no padding copy).
    B2 = 300
    x2 = jax.random.normal(k_x2, (B2, D_in), dtype=jnp.float32)
    out2 = jax.block_until_ready(numeric_ae_forward(x2, w1, b1, w2, b2, tile_b=128))
    ref2 = ref_fwd(x2)
    assert out2.shape == (B2, D_lat)
    assert jnp.allclose(out2, ref2, atol=1e-4, rtol=1e-4)

    # 3) bf16 activations/weights (halves HBM read traffic on v6e/v7x), f32 accumulate +
    #    f32 bias/ReLU epilogue.
    out_bf16 = jax.block_until_ready(
        numeric_ae_forward(x.astype(jnp.bfloat16), w1.astype(jnp.bfloat16), b1,
                           w2.astype(jnp.bfloat16), b2))
    assert out_bf16.shape == (B, D_lat)
    assert out_bf16.dtype == jnp.bfloat16
    assert jnp.allclose(out_bf16.astype(jnp.float32), ref, atol=1e-1, rtol=1e-1)

    print("KERNEL_OK")
</pallas_src>

<mosaic_0001>
module attributes {stable_mosaic.version = 11 : i64} {
  func.func @numeric_ae_kernel(%arg0: i32, %arg1: memref<8x32xf32, #tpu.memory_space<vmem>>, %arg2: memref<64x32xf32, #tpu.memory_space<vmem>>, %arg3: memref<1x64xf32, #tpu.memory_space<vmem>>, %arg4: memref<8x64xf32, #tpu.memory_space<vmem>>, %arg5: memref<1x8xf32, #tpu.memory_space<vmem>>, %arg6: memref<8x8xf32, #tpu.memory_space<vmem>>) attributes {dimension_semantics = [#tpu.dimension_semantics<parallel>], iteration_bounds = array<i64: 1>, scalar_prefetch = 0 : i64, scratch_operands = 0 : i64, tpu.core_type = #tpu.core_type<tc>, window_params = [{transform_indices = @transform_0, window_bounds = array<i64: 8, 32>}, {pipeline_mode = #tpu.pipeline_mode<synchronous>, transform_indices = @transform_1, window_bounds = array<i64: 64, 32>}, {pipeline_mode = #tpu.pipeline_mode<synchronous>, transform_indices = @transform_2, window_bounds = array<i64: 1, 64>}, {pipeline_mode = #tpu.pipeline_mode<synchronous>, transform_indices = @transform_3, window_bounds = array<i64: 8, 64>}, {pipeline_mode = #tpu.pipeline_mode<synchronous>, transform_indices = @transform_4, window_bounds = array<i64: 1, 8>}, {transform_indices = @transform_5, window_bounds = array<i64: 8, 8>}]} {
    %c0 = arith.constant 0 : index
    %c0_0 = arith.constant 0 : index
    %0 = vector.load %arg2[%c0, %c0_0] : memref<64x32xf32, #tpu.memory_space<vmem>>, vector<64x32xf32>
    %c0_1 = arith.constant 0 : index
    %c0_2 = arith.constant 0 : index
    %1 = vector.load %arg4[%c0_1, %c0_2] : memref<8x64xf32, #tpu.memory_space<vmem>>, vector<8x64xf32>
    %c0_3 = arith.constant 0 : index
    %c0_4 = arith.constant 0 : index
    %2 = vector.load %arg3[%c0_3, %c0_4] : memref<1x64xf32, #tpu.memory_space<vmem>>, vector<1x64xf32>
    %3 = vector.shape_cast %2 : vector<1x64xf32> to vector<1x64xf32>
    %4 = vector.broadcast %3 : vector<1x64xf32> to vector<8x64xf32>
    %c0_5 = arith.constant 0 : index
    %c0_6 = arith.constant 0 : index
    %5 = vector.load %arg5[%c0_5, %c0_6] : memref<1x8xf32, #tpu.memory_space<vmem>>, vector<1x8xf32>
    %6 = vector.shape_cast %5 : vector<1x8xf32> to vector<1x8xf32>
    %7 = vector.broadcast %6 : vector<1x8xf32> to vector<8x8xf32>
    %c0_i32 = arith.constant 0 : i32
    %c8_i32 = arith.constant 8 : i32
    %8 = arith.muli %c0_i32, %c8_i32 : i32
    %9 = tpu.assume_multiple %8, 8 : i32
    %10 = arith.index_cast %9 : i32 to index
    %c0_7 = arith.constant 0 : index
    %11 = vector.load %arg1[%10, %c0_7] : memref<8x32xf32, #tpu.memory_space<vmem>>, vector<8x32xf32>
    %cst = arith.constant dense<0.000000e+00> : vector<8x64xf32>
    %12 = tpu.matmul %11, %0, %cst {dimension_numbers = #tpu.dot_dimension_numbers<[1], [1], [0], [0], [0, 0, 1, 0], [], []>} : vector<8x32xf32>, vector<64x32xf32>, vector<8x64xf32> -> vector<8x64xf32>
    %13 = arith.addf %12, %4 : vector<8x64xf32>
    %cst_8 = arith.constant 0.000000e+00 : f32
    %14 = vector.broadcast %cst_8 : f32 to vector<8x64xf32>
    %15 = arith.maximumf %13, %14 : vector<8x64xf32>
    %cst_9 = arith.constant dense<0.000000e+00> : vector<8x8xf32>
    %16 = tpu.matmul %15, %1, %cst_9 {dimension_numbers = #tpu.dot_dimension_numbers<[1], [1], [0], [0], [0, 0, 1, 0], [], []>} : vector<8x64xf32>, vector<8x64xf32>, vector<8x8xf32> -> vector<8x8xf32>
    %17 = arith.addf %16, %7 : vector<8x8xf32>
    %18 = arith.index_cast %9 : i32 to index
    %c0_10 = arith.constant 0 : index
    %19 = vector.load %arg6[%18, %c0_10] : memref<8x8xf32, #tpu.memory_space<vmem>>, vector<8x8xf32>
    tpu.vector_store %arg6[%18, %c0_10], %17 {strides = array<i32>} : memref<8x8xf32, #tpu.memory_space<vmem>>, vector<8x8xf32>,
    %c1_i32 = arith.constant 1 : i32
    return
  }
  func.func @transform_0(%arg0: i32) -> (i32, i32) {
    %c0_i32 = arith.constant 0 : i32
    %c0_i32_0 = arith.constant 0 : i32
    return %arg0, %c0_i32 : i32, i32
  }
  func.func @transform_1(%arg0: i32) -> (i32, i32) {
    %c0_i32 = arith.constant 0 : i32
    %c0_i32_0 = arith.constant 0 : i32
    %c0_i32_1 = arith.constant 0 : i32
    return %c0_i32, %c0_i32_0 : i32, i32
  }
  func.func @transform_2(%arg0: i32) -> (i32, i32) {
    %c0_i32 = arith.constant 0 : i32
    %c0_i32_0 = arith.constant 0 : i32
    %c0_i32_1 = arith.constant 0 : i32
    return %c0_i32, %c0_i32_0 : i32, i32
  }
  func.func @transform_3(%arg0: i32) -> (i32, i32) {
    %c0_i32 = arith.constant 0 : i32
    %c0_i32_0 = arith.constant 0 : i32
    %c0_i32_1 = arith.constant 0 : i32
    return %c0_i32, %c0_i32_0 : i32, i32
  }
  func.func @transform_4(%arg0: i32) -> (i32, i32) {
    %c0_i32 = arith.constant 0 : i32
    %c0_i32_0 = arith.constant 0 : i32
    %c0_i32_1 = arith.constant 0 : i32
    return %c0_i32, %c0_i32_0 : i32, i32
  }
  func.func @transform_5(%arg0: i32) -> (i32, i32) {
    %c0_i32 = arith.constant 0 : i32
    %c0_i32_0 = arith.constant 0 : i32
    return %arg0, %c0_i32 : i32, i32
  }
}

</mosaic_0001>

<bundles_post_ra>
// kernel: tpu_custom_call.1
= control target key start
LH: loop header
LB: loop body
LE: loop exit
PB: predicated region body
PF: predicated region fallthrough
CT: control target
= control target key end

     0   :  { %vm45_vm0 = vcmask 261120   ;;  %v329_v2 = vmov 0.0|0.0   ;;  %vm330_vm2 = vmmov 0   ;;  %v331_v5 = vmov 0.0   ;;  %s426_s0 = inlined_call_operand.vmem [shape: f32[8,32], index: 0, kind: input, shape index: {}]   ;;  %s427_s1 = inlined_call_operand.vmem [shape: f32[64,32], index: 1, kind: input, shape index: {}]   ;;  %s428_s2 = inlined_call_operand.vmem [shape: f32[1,64], index: 2, kind: input, shape index: {}]   ;;  %s429_s3 = inlined_call_operand.vmem [shape: f32[8,64], index: 3, kind: input, shape index: {}]   ;;  %s430_s4 = inlined_call_operand.vmem [shape: f32[1,8], index: 4, kind: input, shape index: {}]   ;;  %s431_s5 = inlined_call_operand.hbm [shape: f32[8,8], index: 5, kind: output, shape index: {}]  }
   0x1   :  { %v21_v0 = vld [vmem:[%s427_s1] sm:$0xff]  ;;  %v22_v1 = vld [vmem:[%s427_s1 + $0x8] sm:$0xff]  ;;  %285 = vmatprep.subr.bf16.mxu0 %v329_v2  ;;  %vm371_vm1 = vmpackc.low %vm45_vm0, %vm45_vm0  ;;  %277 = vmatprep.mubr.msk.f32.mxu0 %vm330_vm2, %v331_v5 }
   0x2   :  { %v286_v3 = vpack.c.bf16 %v22_v1, %v21_v0  ;;  %280 = vmatprep.subr.mxu1 %v331_v5  ;;  %282 = vmatprep.mubr.msk.f32.mxu1 %vm330_vm2, %v331_v5 }
   0x4   :  { %288 = vmatpush3.bf16.xpose.msk.msra.mxu0 %vm371_vm1, %v286_v3 }
   0x5   :  { %10 = vsyncpa [#allocation3], 0  ;;  %289 = vmatprep.subr.bf16.mxu0 %v329_v2  ;;  %v23_v6 = vld [vmem:[%s427_s1 + $0x10] sm:$0xff]  ;;  %v24_v7 = vld [vmem:[%s427_s1 + $0x18] sm:$0xff]  ;;  %vm144_vm3 = vcmask 523264   ;;  %vm221_vm4 = vcmask 64512  }
   0x6   :  { %v290_v8 = vpack.c.bf16 %v24_v7, %v23_v6  ;;  %v25_v9 = vld [vmem:[%s427_s1 + $0x20] sm:$0xff]  ;;  %v26_v10 = vld [vmem:[%s427_s1 + $0x28] sm:$0xff]  ;;  %v27_v12 = vld [vmem:[%s427_s1 + $0x30] sm:$0xff] }
   0x7   :  { %v294_v11 = vpack.c.bf16 %v26_v10, %v25_v9  ;;  %v28_v13 = vld [vmem:[%s427_s1 + $0x38] sm:$0xff]  ;;  %v44_v15 = vld [vmem:[%s426_s0] sm:$0xff]  ;;  %s332_s0 = smov [#allocation2]  }
   0x8   :  { %v298_v14 = vpack.c.bf16 %v28_v13, %v27_v12  ;;  %v29_v16 = vld [vmem:[%s429_s3] sm:$0xff]  ;;  %s229_s16 = sshll.u32 %s332_s0, 4  ;;  %s230_s16 = int_to_ptr.vmem [resolvable:$true] %s229_s16 }
   0x9   :  { %281 = vmatpush3.xpose.msk.msra.mxu1 %vm144_vm3, %v29_v16  ;;  %v237_v17 = vld [vmem:[%s428_s2] ss:$0 sm:$0xff]  ;;  %s305_s3 = scalar_lea.vmem %s230_s16, 128  ;;  %p310_p1 = scmp.lt.s32.totalorder %s230_s16, %s230_s16 }
   0xa   :  { %v238_v22 = vld [vmem:[%s430_s4] ss:$0 sm:$0xff]  ;;  %p306_p0 = scmp.ne.s32.totalorder %s230_s16, %s305_s3  ;;  %p311_p2 = scmp.lt.s32.totalorder %s305_s3, %s305_s3 }
   0xc   :  { %292 = vmatpush3.bf16.xpose.msk.msra.mxu0 %vm371_vm1, %v290_v8  ;;  %p312_p3 = por %p311_p2, %p310_p1 }
   0xd   :  { %293 = vmatprep.subr.bf16.mxu0 %v329_v2 }
   0xe   :  { %p313_p4 = pnand %p312_p3, %p306_p0 }
  0x14   :  { %296 = vmatpush3.bf16.xpose.msk.msra.mxu0 %vm371_vm1, %v294_v11 }
  0x15   :  { %297 = vmatprep.subr.bf16.mxu0 %v329_v2 }
  0x1c   :  { %300 = vmatpush3.bf16.xpose.msk.msra.mxu0 %vm371_vm1, %v298_v14 }
  0x23   :  { %278 = vmatmul.mubr.msk.f32.vlgmr.msra.gmra.mrb[0].mxu0 %vm45_vm0, %v44_v15 }
  0xf6   :  { %v139_v18 = vpop.f32.mrb[0].mxu0 }
  0xf7   :  { %v140_v19 = vadd.f32 %v237_v17, %v139_v18  ;;  %v279_v20 = vpop.f32.mrb[1].mxu0 }
  0xf9   :  { %v143_v21 = vmax.f32 %v140_v19, 0.0 }
  0xfb   :  { %283 = vmatmul.mubr.msk.f32.vlgmr.msra.gmra.mrb[0].mxu1 %vm144_vm3, %v143_v21 }
 0x1ce   :  { %v217_v23 = vpop.f32.mrb[0].mxu1 }
 0x1cf   :  { %v218_v24 = vadd.f32 %v238_v22, %v217_v23  ;;  %v284_v25 = vpop.f32.mrb[1].mxu1 }
 0x1d1   :  { %222 = vst.msk [vmem:[#allocation2] sm:$0xff] %vm221_vm4, %v218_v24 }
 0x1d2   :  { %316 = shalt.err (!%p313_p4)
}
 0x1d3   :  { %s317_s18 = scalar_lea.hbm %s431_s5, 128 }
 0x1d4   :  { %p318_p5 = scmp.ne.s32.totalorder %s431_s5, %s317_s18  ;;  %p321_p6 = scmp.lt.u32.totalorder %s317_s18, %s431_s5 }
 0x1d6   :  { %p323_p7 = pnand %p321_p6, %p318_p5 }
 0x1d8   :  { %326 = shalt.err (!%p323_p7)
}
 0x1d9   :  { %232 = dma.vmem_to_hbm [thread:$0]  %s230_s16, 128, %s431_s5, [#allocation3]  }
 0x1da   :  { %327 = dma.done.wait [#allocation3], 128  }
 0x1db   :  { %328 = vsyncadd [#allocation3], 4294967168 }
 0x1dc   :  { %236 = vsyncpa [#allocation3], 1 }

</bundles_post_ra>
